<compile_context>
chip_gen: v5e
topology: v5e:2x2
jax: 0.10.0
libtpu: 0.0.40
codegen_flags: <defaults>
</compile_context>

<pallas_src>
import jax
import jax.numpy as jnp
from jax.experimental import pallas as pl
from jax.experimental.pallas import tpu as pltpu

LANE = 128     # lane (last-dim) granularity
SUBLANE = 8    # sublane (second-to-last) granularity for f32


def _round_up(n, m):
    return ((n + m - 1) // m) * m


def _cdiv(a, b):
    return (a + b - 1) // b


def value_kernel(x_ref, w1_ref, b1_ref, w2_ref, b2_ref, w3_ref, b3_ref, out_ref):
    # Matmuls run in the weights' dtype (bf16 or f32) on the MXU with f32
    # accumulation; bias add / ReLU stay f32 on the VPU.
    cdt = w1_ref.dtype
    x = x_ref[...]

    h1 = jnp.dot(x.astype(cdt), w1_ref[...],
                 preferred_element_type=jnp.float32) + b1_ref[...]
    h1 = jnp.maximum(h1, 0.0)

    h2 = jnp.dot(h1.astype(cdt), w2_ref[...],
                 preferred_element_type=jnp.float32) + b2_ref[...]
    h2 = jnp.maximum(h2, 0.0)

    out = jnp.dot(h2.astype(cdt), w3_ref[...],
                  preferred_element_type=jnp.float32) + b3_ref[...]
    out_ref[...] = out.astype(out_ref.dtype)


def value_forward(x, params, *, block_batch=512):
    """x: (B, input_size), f32 or bf16. params: output of pad_params().

    Returns (B, output_size) f32.
    """
    w1, b1 = params["w1"], params["b1"]
    w2, b2 = params["w2"], params["b2"]
    w3, b3 = params["w3"], params["b3"]

    B, in_size = x.shape
    assert w1.shape[0] == in_size, "x feature dim must match w1 rows"
    h_pad = w1.shape[1]
    out_size = w3.shape[1]

    # --- batch tiling -------------------------------------------------------
    # >=2 grid steps whenever B allows it (shards across v7x's 2 TCs; the extra
    # ~0.35us grid step is noise on v5e/v6e), tile rounded to the sublane so
    # tail padding is bounded by 7 rows instead of a full block_batch.
    if B >= 2 * SUBLANE:
        n_tiles = max(2, _cdiv(B, block_batch))
    else:
        n_tiles = 1
    tb = _round_up(_cdiv(B, n_tiles), SUBLANE)
    b_pad = tb * n_tiles

    x_p = x if b_pad == B else jnp.pad(x, ((0, b_pad - B), (0, 0)))

    # --- VMEM budget (bytes), with margin; capped at v7x physical 64 MiB -----
    wbytes = jnp.dtype(w1.dtype).itemsize
    in_v = _round_up(in_size, LANE)        # VMEM tile-layout padding
    out_v = _round_up(out_size, LANE)
    resident = wbytes * (_round_up(in_size, SUBLANE) * h_pad
                         + h_pad * h_pad + h_pad * out_v)
    resident += 4 * (2 * SUBLANE * h_pad + SUBLANE * out_v)   # f32 biases
    io = 2 * tb * in_v * 4 + 2 * tb * out_v * 4               # double-buffered x/out
    temps = 3 * tb * h_pad * 4                                # h1/h2/acc f32
    vmem_bytes = int(1.5 * (resident + io + temps)) + (2 << 20)
    vmem_bytes = max(min(vmem_bytes, 64 << 20), 16 << 20)

    # --- specs / call --------------------------------------------------------
    x_spec = pl.BlockSpec((tb, in_size), lambda i: (i, 0))        # batch-tiled
    out_spec = pl.BlockSpec((tb, out_size), lambda i: (i, 0))     # unpadded cols

    def make_call(single_buffer_weights):
        kw = dict(pipeline_mode=pl.Buffered(1)) if single_buffer_weights else {}
        res = lambda shape: pl.BlockSpec(shape, lambda i: (0, 0), **kw)
        return pl.pallas_call(
            value_kernel,
            out_shape=jax.ShapeDtypeStruct((b_pad, out_size), jnp.float32),
            grid=(n_tiles,),
            in_specs=[
                x_spec,
                res((in_size, h_pad)),   # w1: resident
                res((1, h_pad)),         # b1
                res((h_pad, h_pad)),     # w2
                res((1, h_pad)),         # b2
                res((h_pad, out_size)),  # w3
                res((1, out_size)),      # b3
            ],
            out_specs=out_spec,
            compiler_params=pltpu.CompilerParams(
                dimension_semantics=("parallel",),
                vmem_limit_bytes=vmem_bytes),
        )

    try:
        out = make_call(True)(x_p, w1, b1, w2, b2, w3, b3)
    except Exception:
        # Fallback: default (double-buffered) resident weights if this Pallas
        # build rejects Buffered(1).
        out = make_call(False)(x_p, w1, b1, w2, b2, w3, b3)

    return out if b_pad == B else out[:B]


def init_params(key, input_size, hidden_size, output_size):
    """PyTorch-like uniform fan-in init, logical (unpadded) shapes, f32.
    Weights stored (in, out) — transposed relative to nn.Linear.weight."""
    ks = jax.random.split(key, 6)

    def linear(kw, kb, fan_in, fan_out):
        bound = 1.0 / jnp.sqrt(fan_in)
        w = jax.random.uniform(kw, (fan_in, fan_out), jnp.float32, -bound, bound)
        b = jax.random.uniform(kb, (1, fan_out), jnp.float32, -bound, bound)
        return w, b

    w1, b1 = linear(ks[0], ks[1], input_size, hidden_size)
    w2, b2 = linear(ks[2], ks[3], hidden_size, hidden_size)
    w3, b3 = linear(ks[4], ks[5], hidden_size, output_size)
    return {"w1": w1, "b1": b1, "w2": w2, "b2": b2, "w3": w3, "b3": b3}


def pad_params(params, *, weight_dtype=jnp.bfloat16):
    """Prepare kernel parameters.

    Only the HIDDEN feature dim is zero-padded to a multiple of 128 (lane-dense
    intermediates); the input and output feature dims stay at their logical
    sizes (blocks equal to the full array dim are legal), which keeps the x and
    out HBM streams minimal. Padded rows/cols are zero, so the padded network
    computes exactly the original values. Weights default to bf16 (native MXU
    dtype on v5e/v6e/v7x; f32 accumulation in-kernel); biases stay f32.
    """
    in_size, hidden = params["w1"].shape
    out_size = params["w3"].shape[1]
    h_pad = _round_up(hidden, LANE)

    def pad2(a, r, c, dtype):
        out = jnp.zeros((r, c), dtype)
        return out.at[:a.shape[0], :a.shape[1]].set(a.astype(dtype))

    return {
        "w1": pad2(params["w1"], in_size, h_pad, weight_dtype),
        "b1": pad2(params["b1"], 1, h_pad, jnp.float32),
        "w2": pad2(params["w2"], h_pad, h_pad, weight_dtype),
        "b2": pad2(params["b2"], 1, h_pad, jnp.float32),
        "w3": pad2(params["w3"], h_pad, out_size, weight_dtype),
        "b3": pad2(params["b3"], 1, out_size, jnp.float32),
    }


def value_forward_ref(x, p):
    h1 = jax.nn.relu(x @ p["w1"] + p["b1"])
    h2 = jax.nn.relu(h1 @ p["w2"] + p["b2"])
    return h2 @ p["w3"] + p["b3"]


if __name__ == "__main__":
    B, INPUT, HIDDEN, OUTPUT = 2, 16, 32, 8

    key = jax.random.PRNGKey(0)
    k_x, k_p = jax.random.split(key)
    x = jax.random.normal(k_x, (B, INPUT), jnp.float32)
    params = init_params(k_p, INPUT, HIDDEN, OUTPUT)
    ref = value_forward_ref(x, params)

    # f32-weight path (tight tolerance).
    pp_f32 = pad_params(params, weight_dtype=jnp.float32)
    out_f32 = jax.block_until_ready(value_forward(x, pp_f32))
    assert out_f32.shape == (B, OUTPUT)
    assert jnp.allclose(out_f32, ref, atol=1e-5, rtol=1e-5)

    # bf16-weight path (default on all generations; f32 accumulation).
    pp_bf16 = pad_params(params)
    out_bf16 = jax.block_until_ready(value_forward(x, pp_bf16))
    assert out_bf16.shape == (B, OUTPUT)
    assert jnp.allclose(out_bf16, ref, atol=3e-2, rtol=3e-2)

    print("KERNEL_OK")
</pallas_src>

<mosaic_0001>
module attributes {stable_mosaic.version = 11 : i64} {
  func.func @value_kernel(%arg0: i32, %arg1: memref<8x16xf32, #tpu.memory_space<vmem>>, %arg2: memref<16x128xf32, #tpu.memory_space<vmem>>, %arg3: memref<1x128xf32, #tpu.memory_space<vmem>>, %arg4: memref<128x128xf32, #tpu.memory_space<vmem>>, %arg5: memref<1x128xf32, #tpu.memory_space<vmem>>, %arg6: memref<128x8xf32, #tpu.memory_space<vmem>>, %arg7: memref<1x8xf32, #tpu.memory_space<vmem>>, %arg8: memref<8x8xf32, #tpu.memory_space<vmem>>) attributes {dimension_semantics = [#tpu.dimension_semantics<parallel>], iteration_bounds = array<i64: 1>, scalar_prefetch = 0 : i64, scratch_operands = 0 : i64, tpu.core_type = #tpu.core_type<tc>, window_params = [{transform_indices = @transform_0, window_bounds = array<i64: 8, 16>}, {pipeline_mode = #tpu.pipeline_mode<synchronous>, transform_indices = @transform_1, window_bounds = array<i64: 16, 128>}, {pipeline_mode = #tpu.pipeline_mode<synchronous>, transform_indices = @transform_2, window_bounds = array<i64: 1, 128>}, {pipeline_mode = #tpu.pipeline_mode<synchronous>, transform_indices = @transform_3, window_bounds = array<i64: 128, 128>}, {pipeline_mode = #tpu.pipeline_mode<synchronous>, transform_indices = @transform_4, window_bounds = array<i64: 1, 128>}, {pipeline_mode = #tpu.pipeline_mode<synchronous>, transform_indices = @transform_5, window_bounds = array<i64: 128, 8>}, {pipeline_mode = #tpu.pipeline_mode<synchronous>, transform_indices = @transform_6, window_bounds = array<i64: 1, 8>}, {transform_indices = @transform_7, window_bounds = array<i64: 8, 8>}]} {
    %c0 = arith.constant 0 : index
    %c0_0 = arith.constant 0 : index
    %0 = vector.load %arg1[%c0, %c0_0] : memref<8x16xf32, #tpu.memory_space<vmem>>, vector<8x16xf32>
    %c0_1 = arith.constant 0 : index
    %c0_2 = arith.constant 0 : index
    %1 = vector.load %arg2[%c0_1, %c0_2] : memref<16x128xf32, #tpu.memory_space<vmem>>, vector<16x128xf32>
    %cst = arith.constant dense<0.000000e+00> : vector<8x128xf32>
    %2 = tpu.matmul %0, %1, %cst {dimension_numbers = #tpu.dot_dimension_numbers<[1], [0], [0], [1], [0, 0, 1, 1], [], []>} : vector<8x16xf32>, vector<16x128xf32>, vector<8x128xf32> -> vector<8x128xf32>
    %c0_3 = arith.constant 0 : index
    %c0_4 = arith.constant 0 : index
    %3 = vector.load %arg3[%c0_3, %c0_4] : memref<1x128xf32, #tpu.memory_space<vmem>>, vector<1x128xf32>
    %4 = vector.broadcast %3 : vector<1x128xf32> to vector<8x128xf32>
    %5 = arith.addf %2, %4 : vector<8x128xf32>
    %cst_5 = arith.constant 0.000000e+00 : f32
    %6 = vector.broadcast %cst_5 : f32 to vector<8x128xf32>
    %7 = arith.maximumf %5, %6 : vector<8x128xf32>
    %c0_6 = arith.constant 0 : index
    %c0_7 = arith.constant 0 : index
    %8 = vector.load %arg4[%c0_6, %c0_7] : memref<128x128xf32, #tpu.memory_space<vmem>>, vector<128x128xf32>
    %cst_8 = arith.constant dense<0.000000e+00> : vector<8x128xf32>
    %9 = tpu.matmul %7, %8, %cst_8 {dimension_numbers = #tpu.dot_dimension_numbers<[1], [0], [0], [1], [0, 0, 1, 1], [], []>} : vector<8x128xf32>, vector<128x128xf32>, vector<8x128xf32> -> vector<8x128xf32>
    %c0_9 = arith.constant 0 : index
    %c0_10 = arith.constant 0 : index
    %10 = vector.load %arg5[%c0_9, %c0_10] : memref<1x128xf32, #tpu.memory_space<vmem>>, vector<1x128xf32>
    %11 = vector.broadcast %10 : vector<1x128xf32> to vector<8x128xf32>
    %12 = arith.addf %9, %11 : vector<8x128xf32>
    %cst_11 = arith.constant 0.000000e+00 : f32
    %13 = vector.broadcast %cst_11 : f32 to vector<8x128xf32>
    %14 = arith.maximumf %12, %13 : vector<8x128xf32>
    %c0_12 = arith.constant 0 : index
    %c0_13 = arith.constant 0 : index
    %15 = vector.load %arg6[%c0_12, %c0_13] : memref<128x8xf32, #tpu.memory_space<vmem>>, vector<128x8xf32>
    %cst_14 = arith.constant dense<0.000000e+00> : vector<8x8xf32>
    %16 = tpu.matmul %14, %15, %cst_14 {dimension_numbers = #tpu.dot_dimension_numbers<[1], [0], [0], [1], [0, 0, 1, 1], [], []>} : vector<8x128xf32>, vector<128x8xf32>, vector<8x8xf32> -> vector<8x8xf32>
    %c0_15 = arith.constant 0 : index
    %c0_16 = arith.constant 0 : index
    %17 = vector.load %arg7[%c0_15, %c0_16] : memref<1x8xf32, #tpu.memory_space<vmem>>, vector<1x8xf32>
    %18 = vector.broadcast %17 : vector<1x8xf32> to vector<8x8xf32>
    %19 = arith.addf %16, %18 : vector<8x8xf32>
    %c0_17 = arith.constant 0 : index
    %c0_18 = arith.constant 0 : index
    %20 = vector.load %arg8[%c0_17, %c0_18] : memref<8x8xf32, #tpu.memory_space<vmem>>, vector<8x8xf32>
    tpu.vector_store %arg8[%c0_17, %c0_18], %19 {strides = array<i32>} : memref<8x8xf32, #tpu.memory_space<vmem>>, vector<8x8xf32>,
    return
  }
  func.func @transform_0(%arg0: i32) -> (i32, i32) {
    %c0_i32 = arith.constant 0 : i32
    %c0_i32_0 = arith.constant 0 : i32
    return %arg0, %c0_i32 : i32, i32
  }
  func.func @transform_1(%arg0: i32) -> (i32, i32) {
    %c0_i32 = arith.constant 0 : i32
    %c0_i32_0 = arith.constant 0 : i32
    %c0_i32_1 = arith.constant 0 : i32
    return %c0_i32, %c0_i32_0 : i32, i32
  }
  func.func @transform_2(%arg0: i32) -> (i32, i32) {
    %c0_i32 = arith.constant 0 : i32
    %c0_i32_0 = arith.constant 0 : i32
    %c0_i32_1 = arith.constant 0 : i32
    return %c0_i32, %c0_i32_0 : i32, i32
  }
  func.func @transform_3(%arg0: i32) -> (i32, i32) {
    %c0_i32 = arith.constant 0 : i32
    %c0_i32_0 = arith.constant 0 : i32
    %c0_i32_1 = arith.constant 0 : i32
    return %c0_i32, %c0_i32_0 : i32, i32
  }
  func.func @transform_4(%arg0: i32) -> (i32, i32) {
    %c0_i32 = arith.constant 0 : i32
    %c0_i32_0 = arith.constant 0 : i32
    %c0_i32_1 = arith.constant 0 : i32
    return %c0_i32, %c0_i32_0 : i32, i32
  }
  func.func @transform_5(%arg0: i32) -> (i32, i32) {
    %c0_i32 = arith.constant 0 : i32
    %c0_i32_0 = arith.constant 0 : i32
    %c0_i32_1 = arith.constant 0 : i32
    return %c0_i32, %c0_i32_0 : i32, i32
  }
  func.func @transform_6(%arg0: i32) -> (i32, i32) {
    %c0_i32 = arith.constant 0 : i32
    %c0_i32_0 = arith.constant 0 : i32
    %c0_i32_1 = arith.constant 0 : i32
    return %c0_i32, %c0_i32_0 : i32, i32
  }
  func.func @transform_7(%arg0: i32) -> (i32, i32) {
    %c0_i32 = arith.constant 0 : i32
    %c0_i32_0 = arith.constant 0 : i32
    return %arg0, %c0_i32 : i32, i32
  }
}

module attributes {stable_mosaic.version = 11 : i64} {
  func.func @value_kernel(%arg0: i32, %arg1: memref<8x16xf32, #tpu.memory_space<vmem>>, %arg2: memref<16x128xf32, #tpu.memory_space<vmem>>, %arg3: memref<1x128xf32, #tpu.memory_space<vmem>>, %arg4: memref<128x128xf32, #tpu.memory_space<vmem>>, %arg5: memref<1x128xf32, #tpu.memory_space<vmem>>, %arg6: memref<128x8xf32, #tpu.memory_space<vmem>>, %arg7: memref<1x8xf32, #tpu.memory_space<vmem>>, %arg8: memref<8x8xf32, #tpu.memory_space<vmem>>) attributes {dimension_semantics = [#tpu.dimension_semantics<parallel>], iteration_bounds = array<i64: 1>, scalar_prefetch = 0 : i64, scratch_operands = 0 : i64, tpu.core_type = #tpu.core_type<tc>, window_params = [{transform_indices = @transform_0, window_bounds = array<i64: 8, 16>}, {pipeline_mode = #tpu.pipeline_mode<synchronous>, transform_indices = @transform_1, window_bounds = array<i64: 16, 128>}, {pipeline_mode = #tpu.pipeline_mode<synchronous>, transform_indices = @transform_2, window_bounds = array<i64: 1, 128>}, {pipeline_mode = #tpu.pipeline_mode<synchronous>, transform_indices = @transform_3, window_bounds = array<i64: 128, 128>}, {pipeline_mode = #tpu.pipeline_mode<synchronous>, transform_indices = @transform_4, window_bounds = array<i64: 1, 128>}, {pipeline_mode = #tpu.pipeline_mode<synchronous>, transform_indices = @transform_5, window_bounds = array<i64: 128, 8>}, {pipeline_mode = #tpu.pipeline_mode<synchronous>, transform_indices = @transform_6, window_bounds = array<i64: 1, 8>}, {transform_indices = @transform_7, window_bounds = array<i64: 8, 8>}]} {
    %c0 = arith.constant 0 : index
    %c0_0 = arith.constant 0 : index
    %0 = vector.load %arg1[%c0, %c0_0] : memref<8x16xf32, #tpu.memory_space<vmem>>, vector<8x16xf32>
    %c0_1 = arith.constant 0 : index
    %c0_2 = arith.constant 0 : index
    %1 = vector.load %arg2[%c0_1, %c0_2] : memref<16x128xf32, #tpu.memory_space<vmem>>, vector<16x128xf32>
    %cst = arith.constant dense<0.000000e+00> : vector<8x128xf32>
    %2 = tpu.matmul %0, %1, %cst {dimension_numbers = #tpu.dot_dimension_numbers<[1], [0], [0], [1], [0, 0, 1, 1], [], []>} : vector<8x16xf32>, vector<16x128xf32>, vector<8x128xf32> -> vector<8x128xf32>
    %c0_3 = arith.constant 0 : index
    %c0_4 = arith.constant 0 : index
    %3 = vector.load %arg3[%c0_3, %c0_4] : memref<1x128xf32, #tpu.memory_space<vmem>>, vector<1x128xf32>
    %4 = vector.broadcast %3 : vector<1x128xf32> to vector<8x128xf32>
    %5 = arith.addf %2, %4 : vector<8x128xf32>
    %cst_5 = arith.constant 0.000000e+00 : f32
    %6 = vector.broadcast %cst_5 : f32 to vector<8x128xf32>
    %7 = arith.maximumf %5, %6 : vector<8x128xf32>
    %c0_6 = arith.constant 0 : index
    %c0_7 = arith.constant 0 : index
    %8 = vector.load %arg4[%c0_6, %c0_7] : memref<128x128xf32, #tpu.memory_space<vmem>>, vector<128x128xf32>
    %cst_8 = arith.constant dense<0.000000e+00> : vector<8x128xf32>
    %9 = tpu.matmul %7, %8, %cst_8 {dimension_numbers = #tpu.dot_dimension_numbers<[1], [0], [0], [1], [0, 0, 1, 1], [], []>} : vector<8x128xf32>, vector<128x128xf32>, vector<8x128xf32> -> vector<8x128xf32>
    %c0_9 = arith.constant 0 : index
    %c0_10 = arith.constant 0 : index
    %10 = vector.load %arg5[%c0_9, %c0_10] : memref<1x128xf32, #tpu.memory_space<vmem>>, vector<1x128xf32>
    %11 = vector.broadcast %10 : vector<1x128xf32> to vector<8x128xf32>
    %12 = arith.addf %9, %11 : vector<8x128xf32>
    %cst_11 = arith.constant 0.000000e+00 : f32
    %13 = vector.broadcast %cst_11 : f32 to vector<8x128xf32>
    %14 = arith.maximumf %12, %13 : vector<8x128xf32>
    %c0_12 = arith.constant 0 : index
    %c0_13 = arith.constant 0 : index
    %15 = vector.load %arg6[%c0_12, %c0_13] : memref<128x8xf32, #tpu.memory_space<vmem>>, vector<128x8xf32>
    %cst_14 = arith.constant dense<0.000000e+00> : vector<8x8xf32>
    %16 = tpu.matmul %14, %15, %cst_14 {dimension_numbers = #tpu.dot_dimension_numbers<[1], [0], [0], [1], [0, 0, 1, 1], [], []>} : vector<8x128xf32>, vector<128x8xf32>, vector<8x8xf32> -> vector<8x8xf32>
    %c0_15 = arith.constant 0 : index
    %c0_16 = arith.constant 0 : index
    %17 = vector.load %arg7[%c0_15, %c0_16] : memref<1x8xf32, #tpu.memory_space<vmem>>, vector<1x8xf32>
    %18 = vector.broadcast %17 : vector<1x8xf32> to vector<8x8xf32>
    %19 = arith.addf %16, %18 : vector<8x8xf32>
    %c0_17 = arith.constant 0 : index
    %c0_18 = arith.constant 0 : index
    %20 = vector.load %arg8[%c0_17, %c0_18] : memref<8x8xf32, #tpu.memory_space<vmem>>, vector<8x8xf32>
    tpu.vector_store %arg8[%c0_17, %c0_18], %19 {strides = array<i32>} : memref<8x8xf32, #tpu.memory_space<vmem>>, vector<8x8xf32>,
    return
  }
  func.func @transform_0(%arg0: i32) -> (i32, i32) {
    %c0_i32 = arith.constant 0 : i32
    %c0_i32_0 = arith.constant 0 : i32
    return %arg0, %c0_i32 : i32, i32
  }
  func.func @transform_1(%arg0: i32) -> (i32, i32) {
    %c0_i32 = arith.constant 0 : i32
    %c0_i32_0 = arith.constant 0 : i32
    %c0_i32_1 = arith.constant 0 : i32
    return %c0_i32, %c0_i32_0 : i32, i32
  }
  func.func @transform_2(%arg0: i32) -> (i32, i32) {
    %c0_i32 = arith.constant 0 : i32
    %c0_i32_0 = arith.constant 0 : i32
    %c0_i32_1 = arith.constant 0 : i32
    return %c0_i32, %c0_i32_0 : i32, i32
  }
  func.func @transform_3(%arg0: i32) -> (i32, i32) {
    %c0_i32 = arith.constant 0 : i32
    %c0_i32_0 = arith.constant 0 : i32
    %c0_i32_1 = arith.constant 0 : i32
    return %c0_i32, %c0_i32_0 : i32, i32
  }
  func.func @transform_4(%arg0: i32) -> (i32, i32) {
    %c0_i32 = arith.constant 0 : i32
    %c0_i32_0 = arith.constant 0 : i32
    %c0_i32_1 = arith.constant 0 : i32
    return %c0_i32, %c0_i32_0 : i32, i32
  }
  func.func @transform_5(%arg0: i32) -> (i32, i32) {
    %c0_i32 = arith.constant 0 : i32
    %c0_i32_0 = arith.constant 0 : i32
    %c0_i32_1 = arith.constant 0 : i32
    return %c0_i32, %c0_i32_0 : i32, i32
  }
  func.func @transform_6(%arg0: i32) -> (i32, i32) {
    %c0_i32 = arith.constant 0 : i32
    %c0_i32_0 = arith.constant 0 : i32
    %c0_i32_1 = arith.constant 0 : i32
    return %c0_i32, %c0_i32_0 : i32, i32
  }
  func.func @transform_7(%arg0: i32) -> (i32, i32) {
    %c0_i32 = arith.constant 0 : i32
    %c0_i32_0 = arith.constant 0 : i32
    return %arg0, %c0_i32 : i32, i32
  }
}

</mosaic_0001>

<bundles_post_ra>
// kernel: tpu_custom_call.1
= control target key start
LH: loop header
LB: loop body
LE: loop exit
PB: predicated region body
PF: predicated region fallthrough
CT: control target
= control target key end

     0   :  { %12 = vsyncpa [#allocation3], 0  ;;  %s393_s0 = inlined_call_operand.vmem [shape: f32[8,16], index: 0, kind: input, shape index: {}]   ;;  %s394_s1 = inlined_call_operand.hbm [shape: f32[16,128], index: 1, kind: input, shape index: {}]   ;;  %s395_s2 = inlined_call_operand.vmem [shape: f32[1,128], index: 2, kind: input, shape index: {}]   ;;  %s396_s3 = inlined_call_operand.vmem [shape: f32[128,128], index: 3, kind: input, shape index: {}]   ;;  %s397_s4 = inlined_call_operand.vmem [shape: f32[1,128], index: 4, kind: input, shape index: {}]   ;;  %s398_s5 = inlined_call_operand.vmem [shape: f32[128,8], index: 5, kind: input, shape index: {}]   ;;  %s399_s6 = inlined_call_operand.vmem [shape: f32[1,8], index: 6, kind: input, shape index: {}]   ;;  %s400_s7 = inlined_call_operand.hbm [shape: f32[8,8], index: 7, kind: output, shape index: {}]  }
   0x1   :  { %13 = vsyncpa [#allocation4], 0  ;;  %s20_s26 = sshll.u32 %s394_s1, 4  ;;  %s235_s27 = smov [#allocation2]   ;;  %s21_s26 = int_to_ptr.hbm [resolvable:$true] %s20_s26 }
   0x2   :  { %s22_s28 = sshll.u32 %s235_s27, 4  ;;  %s236_s29 = smov 128   ;;  %s23_s28 = int_to_ptr.vmem [resolvable:$true] %s22_s28 }
   0x3   :  { %s237_s30 = smov 8  }
   0x4   :  { %28 = dma.hbm_to_vmem [thread:$0]  %s21_s26, 256, %s23_s28, [#allocation3], %s236_s29, %s236_s29, %s237_s30  }
   0x5   :  { %231 = dma.done.wait [#allocation3], 256  }
   0x6   :  { %232 = vsyncadd [#allocation3], 4294967040  ;;  %v45_v0 = vld [vmem:[#allocation2 + $0x8] sm:$0xff]  ;;  %v44_v1 = vld [vmem:[#allocation2] sm:$0xff]  ;;  %vm50_vm0 = vcmask 130048   ;;  %s238_s25 = smov [#allocation5]  }
   0x7   :  { %68 = vmatpush.msra.mxu0 %v45_v0  ;;  %v43_v2 = vld [vmem:[%s393_s0] sm:$0xff]  ;;  %v90_v3 = vld [vmem:[%s396_s3 + $0x78] sm:$0xff]  ;;  %v89_v4 = vld [vmem:[%s396_s3 + $0x70] sm:$0xff]  ;;  %s163_s26 = sshll.u32 %s238_s25, 4  ;;  %s165_s29 = sshll.u32 %s400_s7, 4  ;;  %vm156_vm1 = vcmask 64512   ;;  %s164_s26 = int_to_ptr.vmem [resolvable:$true] %s163_s26  ;;  %s166_s29 = int_to_ptr.hbm [resolvable:$true] %s165_s29 }
   0x8   :  { %95 = vmatpush.msra.mxu1 %v90_v3  ;;  %v88_v5 = vld [vmem:[%s396_s3 + $0x68] sm:$0xff]  ;;  %v87_v6 = vld [vmem:[%s396_s3 + $0x60] sm:$0xff]  ;;  %v86_v7 = vld [vmem:[%s396_s3 + $0x58] sm:$0xff] }
   0x9   :  { %69 = vmatpush.msra.mxu0 %v44_v1  ;;  %v85_v8 = vld [vmem:[%s396_s3 + $0x50] sm:$0xff]  ;;  %v84_v9 = vld [vmem:[%s396_s3 + $0x48] sm:$0xff]  ;;  %v83_v10 = vld [vmem:[%s396_s3 + $0x40] sm:$0xff] }
   0xa   :  { %175 = vmatmul.msk.f32.vlgmr.msra.gmra.mxu0 %vm50_vm0, %v43_v2  ;;  %96 = vmatpush.msra.mxu1 %v89_v4  ;;  %v82_v11 = vld [vmem:[%s396_s3 + $0x38] sm:$0xff]  ;;  %v81_v12 = vld [vmem:[%s396_s3 + $0x30] sm:$0xff]  ;;  %v80_v13 = vld [vmem:[%s396_s3 + $0x28] sm:$0xff] }
   0xb   :  { %v79_v14 = vld [vmem:[%s396_s3 + $0x20] sm:$0xff]  ;;  %v78_v15 = vld [vmem:[%s396_s3 + $0x18] sm:$0xff]  ;;  %v77_v16 = vld [vmem:[%s396_s3 + $0x10] sm:$0xff] }
   0xc   :  { %97 = vmatpush.msra.mxu1 %v88_v5  ;;  %v76_v17 = vld [vmem:[%s396_s3 + $0x8] sm:$0xff]  ;;  %v75_v18 = vld [vmem:[%s396_s3] sm:$0xff]  ;;  %v131_v19 = vld [vmem:[%s398_s5 + $0x78] sm:$0xff] }
   0xd   :  { %v130_v20 = vld [vmem:[%s398_s5 + $0x70] sm:$0xff]  ;;  %136 = vmatpush.msra.mxu2 %v131_v19  ;;  %v129_v21 = vld [vmem:[%s398_s5 + $0x68] sm:$0xff]  ;;  %v128_v22 = vld [vmem:[%s398_s5 + $0x60] sm:$0xff] }
   0xe   :  { %98 = vmatpush.msra.mxu1 %v87_v6  ;;  %v127_v23 = vld [vmem:[%s398_s5 + $0x58] sm:$0xff]  ;;  %v126_v24 = vld [vmem:[%s398_s5 + $0x50] sm:$0xff]  ;;  %v125_v25 = vld [vmem:[%s398_s5 + $0x48] sm:$0xff] }
   0xf   :  { %137 = vmatpush.msra.mxu2 %v130_v20  ;;  %v124_v26 = vld [vmem:[%s398_s5 + $0x40] sm:$0xff]  ;;  %v123_v27 = vld [vmem:[%s398_s5 + $0x38] sm:$0xff]  ;;  %v122_v28 = vld [vmem:[%s398_s5 + $0x30] sm:$0xff] }
  0x10   :  { %99 = vmatpush.msra.mxu1 %v86_v7  ;;  %v121_v29 = vld [vmem:[%s398_s5 + $0x28] sm:$0xff]  ;;  %v120_v30 = vld [vmem:[%s398_s5 + $0x20] sm:$0xff]  ;;  %v119_v31 = vld [vmem:[%s398_s5 + $0x18] sm:$0xff] }
  0x11   :  { %138 = vmatpush.msra.mxu2 %v129_v21  ;;  %v180_v32 = vld [vmem:[%s395_s2] ss:$0 sm:$0xff]  ;;  %v118_v36 = vld [vmem:[%s398_s5 + $0x10] sm:$0xff]  ;;  %v117_v37 = vld [vmem:[%s398_s5 + $0x8] sm:$0xff] }
  0x12   :  { %100 = vmatpush.msra.mxu1 %v85_v8  ;;  %v116_v38 = vld [vmem:[%s398_s5] sm:$0xff] }
  0x13   :  { %139 = vmatpush.msra.mxu2 %v128_v22  ;;  %v181_v39 = vld [vmem:[%s397_s4] ss:$0 sm:$0xff] }
  0x14   :  { %101 = vmatpush.msra.mxu1 %v84_v9  ;;  %v182_v43 = vld [vmem:[%s399_s6] ss:$0 sm:$0xff] }
  0x15   :  { %140 = vmatpush.msra.mxu2 %v127_v23 }
  0x16   :  { %102 = vmatpush.msra.mxu1 %v83_v10 }
  0x17   :  { %141 = vmatpush.msra.mxu2 %v126_v24 }
  0x18   :  { %103 = vmatpush.msra.mxu1 %v82_v11 }
  0x19   :  { %142 = vmatpush.msra.mxu2 %v125_v25 }
  0x1a   :  { %104 = vmatpush.msra.mxu1 %v81_v12 }
  0x1b   :  { %143 = vmatpush.msra.mxu2 %v124_v26 }
  0x1c   :  { %105 = vmatpush.msra.mxu1 %v80_v13 }
  0x1d   :  { %144 = vmatpush.msra.mxu2 %v123_v27 }
  0x1e   :  { %106 = vmatpush.msra.mxu1 %v79_v14 }
  0x1f   :  { %145 = vmatpush.msra.mxu2 %v122_v28 }
  0x20   :  { %107 = vmatpush.msra.mxu1 %v78_v15 }
  0x21   :  { %146 = vmatpush.msra.mxu2 %v121_v29 }
  0x22   :  { %108 = vmatpush.msra.mxu1 %v77_v16 }
  0x23   :  { %147 = vmatpush.msra.mxu2 %v120_v30 }
  0x24   :  { %109 = vmatpush.msra.mxu1 %v76_v17 }
  0x25   :  { %148 = vmatpush.msra.mxu2 %v119_v31 }
  0x26   :  { %110 = vmatpush.msra.mxu1 %v75_v18 }
  0x27   :  { %149 = vmatpush.msra.mxu2 %v118_v36 }
  0x29   :  { %150 = vmatpush.msra.mxu2 %v117_v37 }
  0x2b   :  { %151 = vmatpush.msra.mxu2 %v116_v38 }
  0x87   :  { %v71_v33 = vpop.f32.mrf.mxu0 }
  0x88   :  { %v72_v34 = vadd.f32 %v180_v32, %v71_v33 }
  0x8a   :  { %v74_v35 = vmax.f32 %v72_v34, 0.0 }
  0x8c   :  { %111 = vmatmul.f32.vlgmr.msra.gmra.mxu1 %v74_v35 }
 0x109   :  { %v112_v40 = vpop.f32.mrf.mxu1 }
 0x10a   :  { %v113_v41 = vadd.f32 %v181_v39, %v112_v40 }
 0x10c   :  { %v115_v42 = vmax.f32 %v113_v41, 0.0 }
 0x10e   :  { %152 = vmatmul.f32.vlgmr.msra.gmra.mxu2 %v115_v42 }
 0x191   :  { %v153_v44 = vpop.f32.mrf.mxu2 }
 0x192   :  { %v154_v45 = vadd.f32 %v182_v43, %v153_v44 }
 0x194   :  { %157 = vst.msk [vmem:[#allocation5] sm:$0xff] %vm156_vm1, %v154_v45 }
 0x195   :  { %168 = dma.vmem_to_hbm [thread:$0]  %s164_s26, 128, %s166_s29, [#allocation4]  }
 0x196   :  { %233 = dma.done.wait [#allocation4], 128  }
 0x197   :  { %234 = vsyncadd [#allocation4], 4294967168 }
 0x198   :  { %173 = vsyncpa [#allocation3], 1 }
 0x199   :  { %174 = vsyncpa [#allocation4], 1 }

// kernel: tpu_custom_call.1
= control target key start
LH: loop header
LB: loop body
LE: loop exit
PB: predicated region body
PF: predicated region fallthrough
CT: control target
= control target key end

     0   :  { %12 = vsyncpa [#allocation3], 0  ;;  %s393_s0 = inlined_call_operand.vmem [shape: f32[8,16], index: 0, kind: input, shape index: {}]   ;;  %s394_s1 = inlined_call_operand.hbm [shape: f32[16,128], index: 1, kind: input, shape index: {}]   ;;  %s395_s2 = inlined_call_operand.vmem [shape: f32[1,128], index: 2, kind: input, shape index: {}]   ;;  %s396_s3 = inlined_call_operand.vmem [shape: f32[128,128], index: 3, kind: input, shape index: {}]   ;;  %s397_s4 = inlined_call_operand.vmem [shape: f32[1,128], index: 4, kind: input, shape index: {}]   ;;  %s398_s5 = inlined_call_operand.vmem [shape: f32[128,8], index: 5, kind: input, shape index: {}]   ;;  %s399_s6 = inlined_call_operand.vmem [shape: f32[1,8], index: 6, kind: input, shape index: {}]   ;;  %s400_s7 = inlined_call_operand.hbm [shape: f32[8,8], index: 7, kind: output, shape index: {}]  }
   0x1   :  { %13 = vsyncpa [#allocation4], 0  ;;  %s20_s26 = sshll.u32 %s394_s1, 4  ;;  %s235_s27 = smov [#allocation2]   ;;  %s21_s26 = int_to_ptr.hbm [resolvable:$true] %s20_s26 }
   0x2   :  { %s22_s28 = sshll.u32 %s235_s27, 4  ;;  %s236_s29 = smov 128   ;;  %s23_s28 = int_to_ptr.vmem [resolvable:$true] %s22_s28 }
   0x3   :  { %s237_s30 = smov 8  }
   0x4   :  { %28 = dma.hbm_to_vmem [thread:$0]  %s21_s26, 256, %s23_s28, [#allocation3], %s236_s29, %s236_s29, %s237_s30  }
   0x5   :  { %231 = dma.done.wait [#allocation3], 256  }
   0x6   :  { %232 = vsyncadd [#allocation3], 4294967040  ;;  %v45_v0 = vld [vmem:[#allocation2 + $0x8] sm:$0xff]  ;;  %v44_v1 = vld [vmem:[#allocation2] sm:$0xff]  ;;  %vm50_vm0 = vcmask 130048   ;;  %s238_s25 = smov [#allocation5]  }
   0x7   :  { %68 = vmatpush.msra.mxu0 %v45_v0  ;;  %v43_v2 = vld [vmem:[%s393_s0] sm:$0xff]  ;;  %v90_v3 = vld [vmem:[%s396_s3 + $0x78] sm:$0xff]  ;;  %v89_v4 = vld [vmem:[%s396_s3 + $0x70] sm:$0xff]  ;;  %s163_s26 = sshll.u32 %s238_s25, 4  ;;  %s165_s29 = sshll.u32 %s400_s7, 4  ;;  %vm156_vm1 = vcmask 64512   ;;  %s164_s26 = int_to_ptr.vmem [resolvable:$true] %s163_s26  ;;  %s166_s29 = int_to_ptr.hbm [resolvable:$true] %s165_s29 }
   0x8   :  { %95 = vmatpush.msra.mxu1 %v90_v3  ;;  %v88_v5 = vld [vmem:[%s396_s3 + $0x68] sm:$0xff]  ;;  %v87_v6 = vld [vmem:[%s396_s3 + $0x60] sm:$0xff]  ;;  %v86_v7 = vld [vmem:[%s396_s3 + $0x58] sm:$0xff] }
   0x9   :  { %69 = vmatpush.msra.mxu0 %v44_v1  ;;  %v85_v8 = vld [vmem:[%s396_s3 + $0x50] sm:$0xff]  ;;  %v84_v9 = vld [vmem:[%s396_s3 + $0x48] sm:$0xff]  ;;  %v83_v10 = vld [vmem:[%s396_s3 + $0x40] sm:$0xff] }
   0xa   :  { %175 = vmatmul.msk.f32.vlgmr.msra.gmra.mxu0 %vm50_vm0, %v43_v2  ;;  %96 = vmatpush.msra.mxu1 %v89_v4  ;;  %v82_v11 = vld [vmem:[%s396_s3 + $0x38] sm:$0xff]  ;;  %v81_v12 = vld [vmem:[%s396_s3 + $0x30] sm:$0xff]  ;;  %v80_v13 = vld [vmem:[%s396_s3 + $0x28] sm:$0xff] }
   0xb   :  { %v79_v14 = vld [vmem:[%s396_s3 + $0x20] sm:$0xff]  ;;  %v78_v15 = vld [vmem:[%s396_s3 + $0x18] sm:$0xff]  ;;  %v77_v16 = vld [vmem:[%s396_s3 + $0x10] sm:$0xff] }
   0xc   :  { %97 = vmatpush.msra.mxu1 %v88_v5  ;;  %v76_v17 = vld [vmem:[%s396_s3 + $0x8] sm:$0xff]  ;;  %v75_v18 = vld [vmem:[%s396_s3] sm:$0xff]  ;;  %v131_v19 = vld [vmem:[%s398_s5 + $0x78] sm:$0xff] }
   0xd   :  { %v130_v20 = vld [vmem:[%s398_s5 + $0x70] sm:$0xff]  ;;  %136 = vmatpush.msra.mxu2 %v131_v19  ;;  %v129_v21 = vld [vmem:[%s398_s5 + $0x68] sm:$0xff]  ;;  %v128_v22 = vld [vmem:[%s398_s5 + $0x60] sm:$0xff] }
   0xe   :  { %98 = vmatpush.msra.mxu1 %v87_v6  ;;  %v127_v23 = vld [vmem:[%s398_s5 + $0x58] sm:$0xff]  ;;  %v126_v24 = vld [vmem:[%s398_s5 + $0x50] sm:$0xff]  ;;  %v125_v25 = vld [vmem:[%s398_s5 + $0x48] sm:$0xff] }
   0xf   :  { %137 = vmatpush.msra.mxu2 %v130_v20  ;;  %v124_v26 = vld [vmem:[%s398_s5 + $0x40] sm:$0xff]  ;;  %v123_v27 = vld [vmem:[%s398_s5 + $0x38] sm:$0xff]  ;;  %v122_v28 = vld [vmem:[%s398_s5 + $0x30] sm:$0xff] }
  0x10   :  { %99 = vmatpush.msra.mxu1 %v86_v7  ;;  %v121_v29 = vld [vmem:[%s398_s5 + $0x28] sm:$0xff]  ;;  %v120_v30 = vld [vmem:[%s398_s5 + $0x20] sm:$0xff]  ;;  %v119_v31 = vld [vmem:[%s398_s5 + $0x18] sm:$0xff] }
  0x11   :  { %138 = vmatpush.msra.mxu2 %v129_v21  ;;  %v180_v32 = vld [vmem:[%s395_s2] ss:$0 sm:$0xff]  ;;  %v118_v36 = vld [vmem:[%s398_s5 + $0x10] sm:$0xff]  ;;  %v117_v37 = vld [vmem:[%s398_s5 + $0x8] sm:$0xff] }
  0x12   :  { %100 = vmatpush.msra.mxu1 %v85_v8  ;;  %v116_v38 = vld [vmem:[%s398_s5] sm:$0xff] }
  0x13   :  { %139 = vmatpush.msra.mxu2 %v128_v22  ;;  %v181_v39 = vld [vmem:[%s397_s4] ss:$0 sm:$0xff] }
  0x14   :  { %101 = vmatpush.msra.mxu1 %v84_v9  ;;  %v182_v43 = vld [vmem:[%s399_s6] ss:$0 sm:$0xff] }
  0x15   :  { %140 = vmatpush.msra.mxu2 %v127_v23 }
  0x16   :  { %102 = vmatpush.msra.mxu1 %v83_v10 }
  0x17   :  { %141 = vmatpush.msra.mxu2 %v126_v24 }
  0x18   :  { %103 = vmatpush.msra.mxu1 %v82_v11 }
  0x19   :  { %142 = vmatpush.msra.mxu2 %v125_v25 }
  0x1a   :  { %104 = vmatpush.msra.mxu1 %v81_v12 }
  0x1b   :  { %143 = vmatpush.msra.mxu2 %v124_v26 }
  0x1c   :  { %105 = vmatpush.msra.mxu1 %v80_v13 }
  0x1d   :  { %144 = vmatpush.msra.mxu2 %v123_v27 }
  0x1e   :  { %106 = vmatpush.msra.mxu1 %v79_v14 }
  0x1f   :  { %145 = vmatpush.msra.mxu2 %v122_v28 }
  0x20   :  { %107 = vmatpush.msra.mxu1 %v78_v15 }
  0x21   :  { %146 = vmatpush.msra.mxu2 %v121_v29 }
  0x22   :  { %108 = vmatpush.msra.mxu1 %v77_v16 }
  0x23   :  { %147 = vmatpush.msra.mxu2 %v120_v30 }
  0x24   :  { %109 = vmatpush.msra.mxu1 %v76_v17 }
  0x25   :  { %148 = vmatpush.msra.mxu2 %v119_v31 }
  0x26   :  { %110 = vmatpush.msra.mxu1 %v75_v18 }
  0x27   :  { %149 = vmatpush.msra.mxu2 %v118_v36 }
  0x29   :  { %150 = vmatpush.msra.mxu2 %v117_v37 }
  0x2b   :  { %151 = vmatpush.msra.mxu2 %v116_v38 }
  0x87   :  { %v71_v33 = vpop.f32.mrf.mxu0 }
  0x88   :  { %v72_v34 = vadd.f32 %v180_v32, %v71_v33 }
  0x8a   :  { %v74_v35 = vmax.f32 %v72_v34, 0.0 }
  0x8c   :  { %111 = vmatmul.f32.vlgmr.msra.gmra.mxu1 %v74_v35 }
 0x109   :  { %v112_v40 = vpop.f32.mrf.mxu1 }
 0x10a   :  { %v113_v41 = vadd.f32 %v181_v39, %v112_v40 }
 0x10c   :  { %v115_v42 = vmax.f32 %v113_v41, 0.0 }
 0x10e   :  { %152 = vmatmul.f32.vlgmr.msra.gmra.mxu2 %v115_v42 }
 0x191   :  { %v153_v44 = vpop.f32.mrf.mxu2 }
 0x192   :  { %v154_v45 = vadd.f32 %v182_v43, %v153_v44 }
 0x194   :  { %157 = vst.msk [vmem:[#allocation5] sm:$0xff] %vm156_vm1, %v154_v45 }
 0x195   :  { %168 = dma.vmem_to_hbm [thread:$0]  %s164_s26, 128, %s166_s29, [#allocation4]  }
 0x196   :  { %233 = dma.done.wait [#allocation4], 128  }
 0x197   :  { %234 = vsyncadd [#allocation4], 4294967168 }
 0x198   :  { %173 = vsyncpa [#allocation3], 1 }
 0x199   :  { %174 = vsyncpa [#allocation4], 1 }

</bundles_post_ra>
